<compile_context>
chip_gen: v7x
topology: tpu7x:2x2x1
jax: 0.10.0
libtpu: 0.0.40
codegen_flags: <defaults>
</compile_context>

<pallas_src>
import functools
import math

import jax
import jax.numpy as jnp
from jax.experimental import pallas as pl
from jax.experimental.pallas import tpu as pltpu


def _round_up(x: int, m: int) -> int:
    return ((x + m - 1) // m) * m


def _bilinear_weight_matrix(in_size: int, out_size: int) -> jnp.ndarray:
    """Row-stochastic (out_size, in_size) matrix reproducing torch bilinear
    interpolation with align_corners=False (antialias=False)."""
    scale = float(in_size) / float(out_size)
    dst = jnp.arange(out_size, dtype=jnp.float32)
    src = (dst + 0.5) * scale - 0.5
    # PyTorch clamps negative source coords to 0 when align_corners=False.
    src = jnp.where(src < 0.0, 0.0, src)
    i0 = jnp.floor(src).astype(jnp.int32)
    i0 = jnp.clip(i0, 0, in_size - 1)
    i1 = jnp.minimum(i0 + 1, in_size - 1)
    lam1 = src - i0.astype(jnp.float32)
    lam0 = 1.0 - lam1
    rows = jnp.arange(out_size)
    w = jnp.zeros((out_size, in_size), dtype=jnp.float32)
    w = w.at[rows, i0].add(lam0)
    w = w.at[rows, i1].add(lam1)
    return w


def _resize_kernel(x_ref, wh_ref, ww_ref, o_ref, *, tb, height_first):
    # x_ref : (TB, H, W)            frame batch
    # wh_ref: (new_h, H)            height interpolation weights
    # ww_ref: (W, new_w_pad)        width interpolation weights (transposed, lane-padded)
    # o_ref : (TB, new_h, new_w_pad)
    wh = wh_ref[...]
    ww = ww_ref[...]
    _, h, w = x_ref.shape
    new_w_pad = ww.shape[1]

    if height_first:
        # (new_h, H) @ (H, W) per frame, then (new_h, W) @ (W, new_w_pad) per frame.
        for b in range(tb):
            t = jnp.dot(wh, x_ref[b], preferred_element_type=jnp.float32)
            o_ref[b] = jnp.dot(t, ww, preferred_element_type=jnp.float32)
    else:
        # Width matmul fused over the whole frame batch (lane dim W stays last, so the
        # reshape is free), then per-frame height matmul with lane-dense stores.
        xall = x_ref[...].reshape(tb * h, w)                                 # (TB*H, W)
        tall = jnp.dot(xall, ww, preferred_element_type=jnp.float32)         # (TB*H, new_w_pad)
        t3 = tall.reshape(tb, h, new_w_pad)                                  # free reshape
        for b in range(tb):
            o_ref[b] = jnp.dot(wh, t3[b], preferred_element_type=jnp.float32)


def short_side_scale_pallas(x: jnp.ndarray, size: int, *, _force_order=None) -> jnp.ndarray:
    """x: (C, T, H, W) float32 -> (C, T, new_h, new_w) float32, bilinear resize,
    short spatial side scaled to `size`, aspect ratio preserved (floor on long side)."""
    assert x.ndim == 4
    assert x.dtype == jnp.float32
    c, t, h, w = x.shape
    if w < h:
        new_h = int(math.floor(float(h) / w * size))
        new_w = size
    else:
        new_h = size
        new_w = int(math.floor(float(w) / h * size))

    # Lane-dense output: pad the output width up to a multiple of 128 with zero columns
    # of W_w; the pad is sliced away after the kernel.
    new_w_pad = _round_up(new_w, 128)
    w_h = _bilinear_weight_matrix(h, new_h)                      # (new_h, H)
    w_w = _bilinear_weight_matrix(w, new_w).T                    # (W, new_w)
    w_w = jnp.pad(w_w, ((0, 0), (0, new_w_pad - new_w)))         # (W, new_w_pad)

    # Static contraction-order choice (MXU FLOPs per frame, including lane padding).
    flops_height_first = new_h * w * (h + new_w_pad)
    flops_width_first = h * new_w_pad * (w + new_h)
    if _force_order is None:
        height_first = flops_height_first <= flops_width_first
    else:
        height_first = _force_order == "height_first"

    n = c * t

    # Frame-batch size TB from a conservative VMEM budget (fits v5e/v6e/v7x):
    #   2x double-buffered (TB,H,W) input + 2x (TB,new_h,new_w_pad) output + 2x weights.
    bytes_in = h * w * 4
    bytes_out = new_h * new_w_pad * 4
    bytes_wts = (new_h * h + w * new_w_pad) * 4
    budget = 40 * 1024 * 1024
    tb = (budget - 2 * bytes_wts) // (2 * (bytes_in + bytes_out))
    tb = max(1, min(int(tb), n, 32))
    # TODO(synk): frames too large to double-buffer even at TB=1 (e.g. 4K f32 on v7x's
    # 64 MiB VMEM) would need an extra H-tiling reduction axis; not implemented.

    n_pad = _round_up(n, tb)
    x_flat = x.reshape(n, h, w)
    if n_pad != n:
        x_flat = jnp.pad(x_flat, ((0, n_pad - n), (0, 0), (0, 0)))

    vmem_needed = 2 * tb * (bytes_in + bytes_out) + 2 * bytes_wts
    vmem_limit = min(128 * 1024 * 1024, max(64 * 1024 * 1024, vmem_needed + (4 << 20)))

    kernel = functools.partial(_resize_kernel, tb=tb, height_first=height_first)

    out_flat = pl.pallas_call(
        kernel,
        out_shape=jax.ShapeDtypeStruct((n_pad, new_h, new_w_pad), jnp.float32),
        grid_spec=pltpu.PrefetchScalarGridSpec(
            num_scalar_prefetch=0,
            grid=(n_pad // tb,),
            in_specs=[
                pl.BlockSpec((tb, h, w), lambda i: (i, 0, 0)),
                # Weight matrices: constant block index across the grid (fetched once).
                pl.BlockSpec((new_h, h), lambda i: (0, 0)),
                pl.BlockSpec((w, new_w_pad), lambda i: (0, 0)),
            ],
            out_specs=pl.BlockSpec((tb, new_h, new_w_pad), lambda i: (i, 0, 0)),
        ),
        compiler_params=pltpu.CompilerParams(
            dimension_semantics=("parallel",),
            vmem_limit_bytes=vmem_limit,
        ),
    )(x_flat, w_h, w_w)

    out = out_flat[:n, :, :new_w].reshape(c, t, new_h, new_w)
    return out


class ShortSideScale:
    """Mirror of the torch.nn.Module wrapper (pytorch backend, bilinear only)."""

    def __init__(self, size: int, interpolation: str = "bilinear", backend: str = "pytorch"):
        assert interpolation == "bilinear"
        assert backend == "pytorch"
        # TODO(synk): 'opencv' backend and other interpolation modes not implemented.
        self._size = size

    def __call__(self, x: jnp.ndarray) -> jnp.ndarray:
        return short_side_scale_pallas(x, self._size)


if __name__ == "__main__":
    key = jax.random.PRNGKey(0)
    # Small video: C=4 channels, T=2 frames, H=16, W=24 (W >= H so H is the short side).
    C, T, H, W = 4, 2, 16, 24
    size = 12
    x = jax.random.normal(key, (C, T, H, W), dtype=jnp.float32)

    mod = ShortSideScale(size=size)
    out = mod(x)
    out = jax.block_until_ready(out)

    # Expected output spatial size: new_h = 12, new_w = floor(24/16*12) = 18.
    assert out.shape == (C, T, 12, 18), out.shape
    assert out.dtype == jnp.float32

    # Pure-JAX reference using the same (unpadded) weight matrices.
    w_h = _bilinear_weight_matrix(H, 12)
    w_w = _bilinear_weight_matrix(W, 18)
    ref = jnp.einsum("ph,cthw,qw->ctpq", w_h, x, w_w)
    assert jnp.allclose(out, ref, atol=1e-5, rtol=1e-5)

    # Also exercise the width-first contraction branch explicitly.
    out_wf = short_side_scale_pallas(x, size, _force_order="width_first")
    out_wf = jax.block_until_ready(out_wf)
    assert out_wf.shape == (C, T, 12, 18)
    assert jnp.allclose(out_wf, ref, atol=1e-5, rtol=1e-5)

    print("KERNEL_OK")
</pallas_src>

<mosaic_0001>
module attributes {stable_mosaic.version = 11 : i64} {
  func.func @_resize_kernel(%arg0: i32, %arg1: memref<8x16x24xf32, #tpu.memory_space<vmem>>, %arg2: memref<12x16xf32, #tpu.memory_space<vmem>>, %arg3: memref<24x128xf32, #tpu.memory_space<vmem>>, %arg4: memref<8x12x128xf32, #tpu.memory_space<vmem>>) attributes {dimension_semantics = [#tpu.dimension_semantics<parallel>], iteration_bounds = array<i64: 1>, scalar_prefetch = 0 : i64, scratch_operands = 0 : i64, tpu.core_type = #tpu.core_type<tc>, window_params = [{transform_indices = @transform_0, window_bounds = array<i64: 8, 16, 24>}, {pipeline_mode = #tpu.pipeline_mode<synchronous>, transform_indices = @transform_1, window_bounds = array<i64: 12, 16>}, {pipeline_mode = #tpu.pipeline_mode<synchronous>, transform_indices = @transform_2, window_bounds = array<i64: 24, 128>}, {transform_indices = @transform_3, window_bounds = array<i64: 8, 12, 128>}]} {
    %c0 = arith.constant 0 : index
    %c0_0 = arith.constant 0 : index
    %0 = vector.load %arg2[%c0, %c0_0] : memref<12x16xf32, #tpu.memory_space<vmem>>, vector<12x16xf32>
    %c0_1 = arith.constant 0 : index
    %c0_2 = arith.constant 0 : index
    %1 = vector.load %arg3[%c0_1, %c0_2] : memref<24x128xf32, #tpu.memory_space<vmem>>, vector<24x128xf32>
    %c0_3 = arith.constant 0 : index
    %c0_4 = arith.constant 0 : index
    %c0_5 = arith.constant 0 : index
    %2 = vector.load %arg1[%c0_3, %c0_4, %c0_5] : memref<8x16x24xf32, #tpu.memory_space<vmem>>, vector<1x16x24xf32>
    %3 = vector.shape_cast %2 : vector<1x16x24xf32> to vector<16x24xf32>
    %cst = arith.constant dense<0.000000e+00> : vector<12x24xf32>
    %4 = tpu.matmul %0, %3, %cst {dimension_numbers = #tpu.dot_dimension_numbers<[1], [0], [0], [1], [0, 0, 1, 1], [], []>} : vector<12x16xf32>, vector<16x24xf32>, vector<12x24xf32> -> vector<12x24xf32>
    %cst_6 = arith.constant dense<0.000000e+00> : vector<12x128xf32>
    %5 = tpu.matmul %4, %1, %cst_6 {dimension_numbers = #tpu.dot_dimension_numbers<[1], [0], [0], [1], [0, 0, 1, 1], [], []>} : vector<12x24xf32>, vector<24x128xf32>, vector<12x128xf32> -> vector<12x128xf32>
    %c0_7 = arith.constant 0 : index
    %c0_8 = arith.constant 0 : index
    %c0_9 = arith.constant 0 : index
    %6 = vector.load %arg4[%c0_7, %c0_8, %c0_9] : memref<8x12x128xf32, #tpu.memory_space<vmem>>, vector<1x12x128xf32>
    %7 = vector.shape_cast %6 : vector<1x12x128xf32> to vector<12x128xf32>
    %8 = vector.shape_cast %5 : vector<12x128xf32> to vector<1x12x128xf32>
    tpu.vector_store %arg4[%c0_7, %c0_8, %c0_9], %8 {strides = array<i32>} : memref<8x12x128xf32, #tpu.memory_space<vmem>>, vector<1x12x128xf32>,
    %c1 = arith.constant 1 : index
    %c0_10 = arith.constant 0 : index
    %c0_11 = arith.constant 0 : index
    %9 = vector.load %arg1[%c1, %c0_10, %c0_11] : memref<8x16x24xf32, #tpu.memory_space<vmem>>, vector<1x16x24xf32>
    %10 = vector.shape_cast %9 : vector<1x16x24xf32> to vector<16x24xf32>
    %cst_12 = arith.constant dense<0.000000e+00> : vector<12x24xf32>
    %11 = tpu.matmul %0, %10, %cst_12 {dimension_numbers = #tpu.dot_dimension_numbers<[1], [0], [0], [1], [0, 0, 1, 1], [], []>} : vector<12x16xf32>, vector<16x24xf32>, vector<12x24xf32> -> vector<12x24xf32>
    %cst_13 = arith.constant dense<0.000000e+00> : vector<12x128xf32>
    %12 = tpu.matmul %11, %1, %cst_13 {dimension_numbers = #tpu.dot_dimension_numbers<[1], [0], [0], [1], [0, 0, 1, 1], [], []>} : vector<12x24xf32>, vector<24x128xf32>, vector<12x128xf32> -> vector<12x128xf32>
    %c1_14 = arith.constant 1 : index
    %c0_15 = arith.constant 0 : index
    %c0_16 = arith.constant 0 : index
    %13 = vector.load %arg4[%c1_14, %c0_15, %c0_16] : memref<8x12x128xf32, #tpu.memory_space<vmem>>, vector<1x12x128xf32>
    %14 = vector.shape_cast %13 : vector<1x12x128xf32> to vector<12x128xf32>
    %15 = vector.shape_cast %12 : vector<12x128xf32> to vector<1x12x128xf32>
    tpu.vector_store %arg4[%c1_14, %c0_15, %c0_16], %15 {strides = array<i32>} : memref<8x12x128xf32, #tpu.memory_space<vmem>>, vector<1x12x128xf32>,
    %c2 = arith.constant 2 : index
    %c0_17 = arith.constant 0 : index
    %c0_18 = arith.constant 0 : index
    %16 = vector.load %arg1[%c2, %c0_17, %c0_18] : memref<8x16x24xf32, #tpu.memory_space<vmem>>, vector<1x16x24xf32>
    %17 = vector.shape_cast %16 : vector<1x16x24xf32> to vector<16x24xf32>
    %cst_19 = arith.constant dense<0.000000e+00> : vector<12x24xf32>
    %18 = tpu.matmul %0, %17, %cst_19 {dimension_numbers = #tpu.dot_dimension_numbers<[1], [0], [0], [1], [0, 0, 1, 1], [], []>} : vector<12x16xf32>, vector<16x24xf32>, vector<12x24xf32> -> vector<12x24xf32>
    %cst_20 = arith.constant dense<0.000000e+00> : vector<12x128xf32>
    %19 = tpu.matmul %18, %1, %cst_20 {dimension_numbers = #tpu.dot_dimension_numbers<[1], [0], [0], [1], [0, 0, 1, 1], [], []>} : vector<12x24xf32>, vector<24x128xf32>, vector<12x128xf32> -> vector<12x128xf32>
    %c2_21 = arith.constant 2 : index
    %c0_22 = arith.constant 0 : index
    %c0_23 = arith.constant 0 : index
    %20 = vector.load %arg4[%c2_21, %c0_22, %c0_23] : memref<8x12x128xf32, #tpu.memory_space<vmem>>, vector<1x12x128xf32>
    %21 = vector.shape_cast %20 : vector<1x12x128xf32> to vector<12x128xf32>
    %22 = vector.shape_cast %19 : vector<12x128xf32> to vector<1x12x128xf32>
    tpu.vector_store %arg4[%c2_21, %c0_22, %c0_23], %22 {strides = array<i32>} : memref<8x12x128xf32, #tpu.memory_space<vmem>>, vector<1x12x128xf32>,
    %c3 = arith.constant 3 : index
    %c0_24 = arith.constant 0 : index
    %c0_25 = arith.constant 0 : index
    %23 = vector.load %arg1[%c3, %c0_24, %c0_25] : memref<8x16x24xf32, #tpu.memory_space<vmem>>, vector<1x16x24xf32>
    %24 = vector.shape_cast %23 : vector<1x16x24xf32> to vector<16x24xf32>
    %cst_26 = arith.constant dense<0.000000e+00> : vector<12x24xf32>
    %25 = tpu.matmul %0, %24, %cst_26 {dimension_numbers = #tpu.dot_dimension_numbers<[1], [0], [0], [1], [0, 0, 1, 1], [], []>} : vector<12x16xf32>, vector<16x24xf32>, vector<12x24xf32> -> vector<12x24xf32>
    %cst_27 = arith.constant dense<0.000000e+00> : vector<12x128xf32>
    %26 = tpu.matmul %25, %1, %cst_27 {dimension_numbers = #tpu.dot_dimension_numbers<[1], [0], [0], [1], [0, 0, 1, 1], [], []>} : vector<12x24xf32>, vector<24x128xf32>, vector<12x128xf32> -> vector<12x128xf32>
    %c3_28 = arith.constant 3 : index
    %c0_29 = arith.constant 0 : index
    %c0_30 = arith.constant 0 : index
    %27 = vector.load %arg4[%c3_28, %c0_29, %c0_30] : memref<8x12x128xf32, #tpu.memory_space<vmem>>, vector<1x12x128xf32>
    %28 = vector.shape_cast %27 : vector<1x12x128xf32> to vector<12x128xf32>
    %29 = vector.shape_cast %26 : vector<12x128xf32> to vector<1x12x128xf32>
    tpu.vector_store %arg4[%c3_28, %c0_29, %c0_30], %29 {strides = array<i32>} : memref<8x12x128xf32, #tpu.memory_space<vmem>>, vector<1x12x128xf32>,
    %c4 = arith.constant 4 : index
    %c0_31 = arith.constant 0 : index
    %c0_32 = arith.constant 0 : index
    %30 = vector.load %arg1[%c4, %c0_31, %c0_32] : memref<8x16x24xf32, #tpu.memory_space<vmem>>, vector<1x16x24xf32>
    %31 = vector.shape_cast %30 : vector<1x16x24xf32> to vector<16x24xf32>
    %cst_33 = arith.constant dense<0.000000e+00> : vector<12x24xf32>
    %32 = tpu.matmul %0, %31, %cst_33 {dimension_numbers = #tpu.dot_dimension_numbers<[1], [0], [0], [1], [0, 0, 1, 1], [], []>} : vector<12x16xf32>, vector<16x24xf32>, vector<12x24xf32> -> vector<12x24xf32>
    %cst_34 = arith.constant dense<0.000000e+00> : vector<12x128xf32>
    %33 = tpu.matmul %32, %1, %cst_34 {dimension_numbers = #tpu.dot_dimension_numbers<[1], [0], [0], [1], [0, 0, 1, 1], [], []>} : vector<12x24xf32>, vector<24x128xf32>, vector<12x128xf32> -> vector<12x128xf32>
    %c4_35 = arith.constant 4 : index
    %c0_36 = arith.constant 0 : index
    %c0_37 = arith.constant 0 : index
    %34 = vector.load %arg4[%c4_35, %c0_36, %c0_37] : memref<8x12x128xf32, #tpu.memory_space<vmem>>, vector<1x12x128xf32>
    %35 = vector.shape_cast %34 : vector<1x12x128xf32> to vector<12x128xf32>
    %36 = vector.shape_cast %33 : vector<12x128xf32> to vector<1x12x128xf32>
    tpu.vector_store %arg4[%c4_35, %c0_36, %c0_37], %36 {strides = array<i32>} : memref<8x12x128xf32, #tpu.memory_space<vmem>>, vector<1x12x128xf32>,
    %c5 = arith.constant 5 : index
    %c0_38 = arith.constant 0 : index
    %c0_39 = arith.constant 0 : index
    %37 = vector.load %arg1[%c5, %c0_38, %c0_39] : memref<8x16x24xf32, #tpu.memory_space<vmem>>, vector<1x16x24xf32>
    %38 = vector.shape_cast %37 : vector<1x16x24xf32> to vector<16x24xf32>
    %cst_40 = arith.constant dense<0.000000e+00> : vector<12x24xf32>
    %39 = tpu.matmul %0, %38, %cst_40 {dimension_numbers = #tpu.dot_dimension_numbers<[1], [0], [0], [1], [0, 0, 1, 1], [], []>} : vector<12x16xf32>, vector<16x24xf32>, vector<12x24xf32> -> vector<12x24xf32>
    %cst_41 = arith.constant dense<0.000000e+00> : vector<12x128xf32>
    %40 = tpu.matmul %39, %1, %cst_41 {dimension_numbers = #tpu.dot_dimension_numbers<[1], [0], [0], [1], [0, 0, 1, 1], [], []>} : vector<12x24xf32>, vector<24x128xf32>, vector<12x128xf32> -> vector<12x128xf32>
    %c5_42 = arith.constant 5 : index
    %c0_43 = arith.constant 0 : index
    %c0_44 = arith.constant 0 : index
    %41 = vector.load %arg4[%c5_42, %c0_43, %c0_44] : memref<8x12x128xf32, #tpu.memory_space<vmem>>, vector<1x12x128xf32>
    %42 = vector.shape_cast %41 : vector<1x12x128xf32> to vector<12x128xf32>
    %43 = vector.shape_cast %40 : vector<12x128xf32> to vector<1x12x128xf32>
    tpu.vector_store %arg4[%c5_42, %c0_43, %c0_44], %43 {strides = array<i32>} : memref<8x12x128xf32, #tpu.memory_space<vmem>>, vector<1x12x128xf32>,
    %c6 = arith.constant 6 : index
    %c0_45 = arith.constant 0 : index
    %c0_46 = arith.constant 0 : index
    %44 = vector.load %arg1[%c6, %c0_45, %c0_46] : memref<8x16x24xf32, #tpu.memory_space<vmem>>, vector<1x16x24xf32>
    %45 = vector.shape_cast %44 : vector<1x16x24xf32> to vector<16x24xf32>
    %cst_47 = arith.constant dense<0.000000e+00> : vector<12x24xf32>
    %46 = tpu.matmul %0, %45, %cst_47 {dimension_numbers = #tpu.dot_dimension_numbers<[1], [0], [0], [1], [0, 0, 1, 1], [], []>} : vector<12x16xf32>, vector<16x24xf32>, vector<12x24xf32> -> vector<12x24xf32>
    %cst_48 = arith.constant dense<0.000000e+00> : vector<12x128xf32>
    %47 = tpu.matmul %46, %1, %cst_48 {dimension_numbers = #tpu.dot_dimension_numbers<[1], [0], [0], [1], [0, 0, 1, 1], [], []>} : vector<12x24xf32>, vector<24x128xf32>, vector<12x128xf32> -> vector<12x128xf32>
    %c6_49 = arith.constant 6 : index
    %c0_50 = arith.constant 0 : index
    %c0_51 = arith.constant 0 : index
    %48 = vector.load %arg4[%c6_49, %c0_50, %c0_51] : memref<8x12x128xf32, #tpu.memory_space<vmem>>, vector<1x12x128xf32>
    %49 = vector.shape_cast %48 : vector<1x12x128xf32> to vector<12x128xf32>
    %50 = vector.shape_cast %47 : vector<12x128xf32> to vector<1x12x128xf32>
    tpu.vector_store %arg4[%c6_49, %c0_50, %c0_51], %50 {strides = array<i32>} : memref<8x12x128xf32, #tpu.memory_space<vmem>>, vector<1x12x128xf32>,
    %c7 = arith.constant 7 : index
    %c0_52 = arith.constant 0 : index
    %c0_53 = arith.constant 0 : index
    %51 = vector.load %arg1[%c7, %c0_52, %c0_53] : memref<8x16x24xf32, #tpu.memory_space<vmem>>, vector<1x16x24xf32>
    %52 = vector.shape_cast %51 : vector<1x16x24xf32> to vector<16x24xf32>
    %cst_54 = arith.constant dense<0.000000e+00> : vector<12x24xf32>
    %53 = tpu.matmul %0, %52, %cst_54 {dimension_numbers = #tpu.dot_dimension_numbers<[1], [0], [0], [1], [0, 0, 1, 1], [], []>} : vector<12x16xf32>, vector<16x24xf32>, vector<12x24xf32> -> vector<12x24xf32>
    %cst_55 = arith.constant dense<0.000000e+00> : vector<12x128xf32>
    %54 = tpu.matmul %53, %1, %cst_55 {dimension_numbers = #tpu.dot_dimension_numbers<[1], [0], [0], [1], [0, 0, 1, 1], [], []>} : vector<12x24xf32>, vector<24x128xf32>, vector<12x128xf32> -> vector<12x128xf32>
    %c7_56 = arith.constant 7 : index
    %c0_57 = arith.constant 0 : index
    %c0_58 = arith.constant 0 : index
    %55 = vector.load %arg4[%c7_56, %c0_57, %c0_58] : memref<8x12x128xf32, #tpu.memory_space<vmem>>, vector<1x12x128xf32>
    %56 = vector.shape_cast %55 : vector<1x12x128xf32> to vector<12x128xf32>
    %57 = vector.shape_cast %54 : vector<12x128xf32> to vector<1x12x128xf32>
    tpu.vector_store %arg4[%c7_56, %c0_57, %c0_58], %57 {strides = array<i32>} : memref<8x12x128xf32, #tpu.memory_space<vmem>>, vector<1x12x128xf32>,
    return
  }
  func.func @transform_0(%arg0: i32) -> (i32, i32, i32) {
    %c0_i32 = arith.constant 0 : i32
    %c0_i32_0 = arith.constant 0 : i32
    %c0_i32_1 = arith.constant 0 : i32
    return %arg0, %c0_i32, %c0_i32_0 : i32, i32, i32
  }
  func.func @transform_1(%arg0: i32) -> (i32, i32) {
    %c0_i32 = arith.constant 0 : i32
    %c0_i32_0 = arith.constant 0 : i32
    %c0_i32_1 = arith.constant 0 : i32
    return %c0_i32, %c0_i32_0 : i32, i32
  }
  func.func @transform_2(%arg0: i32) -> (i32, i32) {
    %c0_i32 = arith.constant 0 : i32
    %c0_i32_0 = arith.constant 0 : i32
    %c0_i32_1 = arith.constant 0 : i32
    return %c0_i32, %c0_i32_0 : i32, i32
  }
  func.func @transform_3(%arg0: i32) -> (i32, i32, i32) {
    %c0_i32 = arith.constant 0 : i32
    %c0_i32_0 = arith.constant 0 : i32
    %c0_i32_1 = arith.constant 0 : i32
    return %arg0, %c0_i32, %c0_i32_0 : i32, i32, i32
  }
}

</mosaic_0001>

<bundles_post_ra>
// kernel: tpu_custom_call.1
= control target key start
LH: loop header
LB: loop body
LE: loop exit
PB: predicated region body
PF: predicated region fallthrough
CT: control target
= control target key end

     0   :  { %8 = vsyncpa [#allocation3], 0  ;;  %s1958_s0 = inlined_call_operand.hbm [shape: f32[8,16,24], index: 0, kind: input, shape index: {}]   ;;  %s1959_s1 = inlined_call_operand.hbm [shape: f32[12,16], index: 1, kind: input, shape index: {}]   ;;  %s1960_s2 = inlined_call_operand.hbm [shape: f32[24,128], index: 2, kind: input, shape index: {}]   ;;  %s1961_s3 = inlined_call_operand.hbm [shape: f32[8,12,128], index: 3, kind: output, shape index: {}]  }
   0x1   :  { %9 = vsyncpa [#allocation6], 0 }
   0x2   :  { %10 = vsyncpa [#allocation4], 0  ;;  %s1777_s12 = smov [#allocation5]   ;;  %s1778_s14 = smov [#allocation2]  }
   0x3   :  { %s28_s13 = sshll.u32 %s1777_s12, 4  ;;  %s16_s15 = sshll.u32 %s1778_s14, 4  ;;  %s29_s13 = int_to_ptr.vmem [resolvable:$true] %s28_s13  ;;  %s1803_s15 = int_to_ptr.vmem [resolvable:$true] %s16_s15 }
   0x4   :  { %s1683_s18 = scalar_lea.hbm %s1959_s1, 256 }
   0x5   :  { %p1684_p0 = scmp.ne.s32.totalorder %s1959_s1, %s1683_s18  ;;  %p1687_p1 = scmp.lt.u32.totalorder %s1683_s18, %s1959_s1 }
   0x7   :  { %p1689_p2 = pnand %p1687_p1, %p1684_p0 }
   0x9   :  { %1692 = shalt.err (!%p1689_p2)
}
   0xa   :  { %s1693_s23 = scalar_lea.vmem %s29_s13, 256  ;;  %p1698_p4 = scmp.lt.s32.totalorder %s29_s13, %s29_s13 }
   0xb   :  { %p1694_p3 = scmp.ne.s32.totalorder %s29_s13, %s1693_s23  ;;  %p1699_p5 = scmp.lt.s32.totalorder %s1693_s23, %s1693_s23 }
   0xd   :  { %p1700_p6 = por %p1699_p5, %p1698_p4 }
   0xf   :  { %p1701_p7 = pnand %p1700_p6, %p1694_p3 }
  0x11   :  { %1704 = shalt.err (!%p1701_p7)
}
  0x12   :  { %s1779_s24 = smov 128   ;;  %s1780_s25 = smov 8  }
  0x13   :  { %34 = dma.hbm_to_vmem [thread:$0]  %s1959_s1, 256, %s29_s13, [#allocation6], %s1779_s24, %s1779_s24, %s1780_s25  }
  0x14   :  { %s1705_s30 = scalar_lea.hbm %s1958_s0, 2048 }
  0x15   :  { %p1706_p8 = scmp.ne.s32.totalorder %s1958_s0, %s1705_s30  ;;  %p1709_p9 = scmp.lt.u32.totalorder %s1705_s30, %s1958_s0 }
  0x17   :  { %p1711_p10 = pnand %p1709_p9, %p1706_p8 }
  0x19   :  { %1714 = shalt.err (!%p1711_p10)
}
  0x1a   :  { %s1715_s8 = scalar_lea.vmem %s1803_s15, 2048  ;;  %p1720_p12 = scmp.lt.s32.totalorder %s1803_s15, %s1803_s15 }
  0x1b   :  { %p1716_p11 = scmp.ne.s32.totalorder %s1803_s15, %s1715_s8  ;;  %p1721_p13 = scmp.lt.s32.totalorder %s1715_s8, %s1715_s8 }
  0x1d   :  { %p1722_p0 = por %p1721_p13, %p1720_p12 }
  0x1f   :  { %p1723_p1 = pnand %p1722_p0, %p1716_p11 }
  0x21   :  { %1726 = shalt.err (!%p1723_p1)
}
  0x22   :  { %22 = dma.hbm_to_vmem [thread:$0]  %s1958_s0, 2048, %s1803_s15, [#allocation3], %s1779_s24, %s1779_s24, %s1780_s25  }
  0x23   :  { %s1781_s10 = smov [#allocation7]   ;;  %s1727_s14 = scalar_lea.hbm %s1960_s2, 384 }
  0x24   :  { %s40_s11 = sshll.u32 %s1781_s10, 4  ;;  %p1728_p2 = scmp.ne.s32.totalorder %s1960_s2, %s1727_s14  ;;  %s41_s11 = int_to_ptr.vmem [resolvable:$true] %s40_s11 }
  0x25   :  { %p1731_p3 = scmp.lt.u32.totalorder %s1727_s14, %s1960_s2 }
  0x27   :  { %p1733_p4 = pnand %p1731_p3, %p1728_p2 }
  0x29   :  { %1736 = shalt.err (!%p1733_p4)
}
  0x2a   :  { %s1737_s20 = scalar_lea.vmem %s41_s11, 384  ;;  %p1742_p6 = scmp.lt.s32.totalorder %s41_s11, %s41_s11 }
  0x2b   :  { %p1738_p5 = scmp.ne.s32.totalorder %s41_s11, %s1737_s20  ;;  %p1743_p7 = scmp.lt.s32.totalorder %s1737_s20, %s1737_s20 }
  0x2d   :  { %p1744_p8 = por %p1743_p7, %p1742_p6 }
  0x2f   :  { %p1745_p9 = pnand %p1744_p8, %p1738_p5 }
  0x31   :  { %1748 = shalt.err (!%p1745_p9)
}
  0x32   :  { %46 = dma.hbm_to_vmem [thread:$0]  %s1960_s2, 384, %s41_s11, [#allocation6], %s1779_s24, %s1779_s24, %s1780_s25  }
  0x33   :  { %1771 = dma.done.wait [#allocation3], 2048  }
  0x34   :  { %1772 = vsyncadd [#allocation3], 4294965248 }
  0x35   :  { %1773 = dma.done.wait [#allocation6], 640  }
  0x36   :  { %1774 = vsyncadd [#allocation6], 4294966656  ;;  %vm63_vm0 = vcmask 130048   ;;  %v61_v0 = vld [vmem:[#allocation2] sm:$0xff]  ;;  %v62_v1 = vld [vmem:[#allocation2 + $0x8] sm:$0xff]  ;;  %vm145_vm1 = vcmask 195584  }
  0x37   :  { %v1855_v2 = vld [vmem:[#allocation5] sm:$0xff]  ;;  %v1613_v3 = vpack.c.bf16 %v62_v1, %v61_v0  ;;  %v230_v4 = vld [vmem:[#allocation2 + $0x10] sm:$0xff]  ;;  %v231_v5 = vld [vmem:[#allocation2 + $0x18] sm:$0xff]  ;;  %s1782_s2 = smov [#allocation8]  }
  0x38   :  { %1489 = vmatprep.mubr.msk.f32.mxu0 %vm63_vm0, %v1855_v2  ;;  %v1621_v6 = vpack.c.bf16 %v231_v5, %v230_v4  ;;  %v58_v7 = vld [vmem:[#allocation7] sm:$0xff]  ;;  %v59_v8 = vld [vmem:[#allocation7 + $0x8] sm:$0xff]  ;;  %v1861_v10 = vld [vmem:[#allocation5 + $0x8] sm:$0xf]  ;;  %s1368_s21 = sshll.u32 %s1782_s2, 4  ;;  %s1369_s21 = int_to_ptr.vmem [resolvable:$true] %s1368_s21 }
  0x39   :  { %1614 = vmatprep.subr.bf16.mxu0 %v1613_v3  ;;  %v1859_v9 = vpack.c.bf16 %v59_v8, %v58_v7  ;;  %v1873_v11 = vld [vmem:[#allocation7 + $0x10] sm:$0xff]  ;;  %v393_v13 = vld [vmem:[#allocation2 + $0x28] sm:$0xff]  ;;  %v554_v17 = vld [vmem:[#allocation2 + $0x30] sm:$0xff]  ;;  %s1749_s22 = scalar_lea.vmem %s1369_s21, 2048  ;;  %p1754_p11 = scmp.lt.s32.totalorder %s1369_s21, %s1369_s21 }
  0x3a   :  { %1616 = vmatpush3.bf16.msra.mxu0 %v1613_v3  ;;  %v392_v12 = vld [vmem:[#allocation2 + $0x20] sm:$0xff]  ;;  %v555_v18 = vld [vmem:[#allocation2 + $0x38] sm:$0xff]  ;;  %v717_v24 = vld [vmem:[#allocation2 + $0x48] sm:$0xff]  ;;  %p1750_p10 = scmp.ne.s32.totalorder %s1369_s21, %s1749_s22  ;;  %p1755_p12 = scmp.lt.s32.totalorder %s1749_s22, %s1749_s22 }
  0x3b   :  { %1622 = vmatprep.subr.bf16.mxu0 %v1621_v6  ;;  %1618 = vmatprep.subr.bf16.mxu1 %v1859_v9  ;;  %v1629_v14 = vpack.c.bf16 %v393_v13, %v392_v12  ;;  %v1637_v21 = vpack.c.bf16 %v555_v18, %v554_v17  ;;  %v716_v23 = vld [vmem:[#allocation2 + $0x40] sm:$0xff]  ;;  %v878_v27 = vld [vmem:[#allocation2 + $0x50] sm:$0xff]  ;;  %v879_v28 = vld [vmem:[#allocation2 + $0x58] sm:$0xff] }
  0x3c   :  { %1620 = vmatpush3.bf16.msra.mxu1 %v1859_v9  ;;  %v1645_v26 = vpack.c.bf16 %v717_v24, %v716_v23  ;;  %v1653_v29 = vpack.c.bf16 %v879_v28, %v878_v27  ;;  %v1040_v39 = vld [vmem:[#allocation2 + $0x60] sm:$0xff]  ;;  %v1041_v40 = vld [vmem:[#allocation2 + $0x68] sm:$0xff]  ;;  %v1202_v43 = vld [vmem:[#allocation2 + $0x70] sm:$0xff]  ;;  %p1756_p13 = por %p1755_p12, %p1754_p11 }
  0x3d   :  { %1490 = vmatmul.mubr.msk.f32.vlgmr.msra.gmra.mrb[0].mxu0 %vm63_vm0, %v1861_v10  ;;  %1496 = vmatprep.subr.mxu1 %v1873_v11  ;;  %v1661_v42 = vpack.c.bf16 %v1041_v40, %v1040_v39  ;;  %v1203_v44 = vld [vmem:[#allocation2 + $0x78] sm:$0xff] }
  0x3e   :  { %1624 = vmatpush3.bf16.msra.mxu0 %v1621_v6  ;;  %1505 = vmatprep.mubr.msk.f32.mxu0 %vm63_vm0, %v1855_v2  ;;  %v1669_v45 = vpack.c.bf16 %v1203_v44, %v1202_v43  ;;  %p1757_p0 = pnand %p1756_p13, %p1750_p10 }
  0x3f   :  { %1630 = vmatprep.subr.bf16.mxu0 %v1629_v14 }
  0x40   :  { %1497 = vmatpush3.msra.mxu1 %v1873_v11 }
  0x41   :  { %1506 = vmatmul.mubr.msk.f32.vlgmr.msra.gmra.mrb[2].mxu0 %vm63_vm0, %v1861_v10  ;;  %1626 = vmatprep.subr.bf16.mxu1 %v1859_v9 }
  0x42   :  { %1521 = vmatprep.mubr.msk.f32.mxu0 %vm63_vm0, %v1855_v2  ;;  %1632 = vmatpush3.bf16.msra.mxu0 %v1629_v14 }
  0x43   :  { %1634 = vmatprep.subr.bf16.mxu0 %v1859_v9 }
  0x45   :  { %1522 = vmatmul.mubr.msk.f32.vlgmr.msra.gmra.mrb[4].mxu0 %vm63_vm0, %v1861_v10 }
  0x46   :  { %1636 = vmatpush3.bf16.msra.mxu0 %v1859_v9 }
  0x47   :  { %1528 = vmatprep.subr.mxu0 %v1873_v11 }
  0x4a   :  { %1529 = vmatpush3.msra.mxu0 %v1873_v11 }
  0x4b   :  { %1646 = vmatprep.subr.bf16.mxu0 %v1645_v26 }
 0x110   :  { %v1491_v15 = vpop.f32.mrb[0].mxu0 }
 0x111   :  { %v136_v16 = vpop.f32.mrb[1].mxu0 }
 0x112   :  { %1498 = vmatprep.mubr.msk.f32.mxu1 %vm145_vm1, %v136_v16 }
 0x113   :  { %1499 = vmatmul.mubr.msk.f32.vlgmr.msra.gmra.mrb[0].mxu1 %vm145_vm1, %v1491_v15 }
 0x114   :  { %1628 = vmatpush3.bf16.msra.mxu1 %v1859_v9  ;;  %v1507_v19 = vpop.f32.mrb[2].mxu0 }
 0x115   :  { %v298_v20 = vpop.f32.mrb[3].mxu0  ;;  %1512 = vmatprep.subr.mxu1 %v1873_v11 }
 0x116   :  { %1514 = vmatprep.mubr.msk.f32.mxu1 %vm145_vm1, %v298_v20 }
 0x118   :  { %1513 = vmatpush3.msra.mxu1 %v1873_v11  ;;  %v1523_v22 = vpop.f32.mrb[4].mxu0 }
 0x119   :  { %1515 = vmatmul.mubr.msk.f32.vlgmr.msra.gmra.mrb[2].mxu1 %vm145_vm1, %v1507_v19  ;;  %1638 = vmatprep.subr.bf16.mxu1 %v1637_v21  ;;  %v460_v25 = vpop.f32.mrb[5].mxu0 }
 0x11a   :  { %1640 = vmatpush3.bf16.msra.mxu1 %v1637_v21  ;;  %1537 = vmatprep.mubr.msk.f32.mxu1 %vm63_vm0, %v1855_v2 }
 0x11b   :  { %1642 = vmatprep.subr.bf16.mxu1 %v1859_v9  ;;  %1530 = vmatprep.mubr.msk.f32.mxu0 %vm145_vm1, %v460_v25 }
 0x11c   :  { %1531 = vmatmul.mubr.msk.f32.vlgmr.msra.gmra.mrb[6].mxu0 %vm145_vm1, %v1523_v22 }
 0x11d   :  { %1538 = vmatmul.mubr.msk.f32.vlgmr.msra.gmra.mrb[4].mxu1 %vm63_vm0, %v1861_v10  ;;  %1648 = vmatpush3.bf16.msra.mxu0 %v1645_v26 }
 0x11e   :  { %1644 = vmatpush3.bf16.msra.mxu1 %v1859_v9  ;;  %1553 = vmatprep.mubr.msk.f32.mxu0 %vm63_vm0, %v1855_v2 }
 0x11f   :  { %1544 = vmatprep.subr.mxu1 %v1873_v11  ;;  %1650 = vmatprep.subr.bf16.mxu0 %v1859_v9 }
 0x120   :  { %1554 = vmatmul.mubr.msk.f32.vlgmr.msra.gmra.mrb[8].mxu0 %vm63_vm0, %v1861_v10 }
 0x121   :  { %1652 = vmatpush3.bf16.msra.mxu0 %v1859_v9 }
 0x122   :  { %1545 = vmatpush3.msra.mxu1 %v1873_v11  ;;  %1560 = vmatprep.subr.mxu0 %v1873_v11 }
 0x123   :  { %1654 = vmatprep.subr.bf16.mxu1 %v1653_v29 }
 0x125   :  { %1561 = vmatpush3.msra.mxu0 %v1873_v11 }
 0x126   :  { %1662 = vmatprep.subr.bf16.mxu0 %v1661_v42 }
 0x1e6   :  { %v1500_v30 = vpop.f32.mrb[0].mxu1 }
 0x1e7   :  { %228 = vst [vmem:[#allocation8 + $0x8] sm:$0xf] %v1500_v30  ;;  %v218_v31 = vpop.f32.mrb[1].mxu1 }
 0x1e8   :  { %227 = vst [vmem:[#allocation8] sm:$0xff] %v218_v31 }
 0x1ec   :  { %v1516_v32 = vpop.f32.mrb[2].mxu1 }
 0x1ed   :  { %390 = vst [vmem:[#allocation8 + $0x18] sm:$0xf] %v1516_v32  ;;  %v379_v33 = vpop.f32.mrb[3].mxu1 }
 0x1ee   :  { %389 = vst [vmem:[#allocation8 + $0x10] sm:$0xff] %v379_v33 }
 0x1ef   :  { %v1532_v36 = vpop.f32.mrb[6].mxu0 }
 0x1f0   :  { %v1539_v34 = vpop.f32.mrb[4].mxu1  ;;  %552 = vst [vmem:[#allocation8 + $0x28] sm:$0xf] %v1532_v36  ;;  %v541_v37 = vpop.f32.mrb[7].mxu0 }
 0x1f1   :  { %v622_v35 = vpop.f32.mrb[5].mxu1  ;;  %551 = vst [vmem:[#allocation8 + $0x20] sm:$0xff] %v541_v37 }
 0x1f2   :  { %1546 = vmatprep.mubr.msk.f32.mxu1 %vm145_vm1, %v622_v35 }
 0x1f3   :  { %1547 = vmatmul.mubr.msk.f32.vlgmr.msra.gmra.mrb[6].mxu1 %vm145_vm1, %v1539_v34  ;;  %v1555_v38 = vpop.f32.mrb[8].mxu0 }
 0x1f4   :  { %1656 = vmatpush3.bf16.msra.mxu1 %v1653_v29  ;;  %1569 = vmatprep.mubr.msk.f32.mxu1 %vm63_vm0, %v1855_v2  ;;  %v784_v41 = vpop.f32.mrb[9].mxu0 }
 0x1f5   :  { %1658 = vmatprep.subr.bf16.mxu1 %v1859_v9  ;;  %1562 = vmatprep.mubr.msk.f32.mxu0 %vm145_vm1, %v784_v41 }
 0x1f6   :  { %1563 = vmatmul.mubr.msk.f32.vlgmr.msra.gmra.mrb[10].mxu0 %vm145_vm1, %v1555_v38 }
 0x1f7   :  { %1570 = vmatmul.mubr.msk.f32.vlgmr.msra.gmra.mrb[8].mxu1 %vm63_vm0, %v1861_v10  ;;  %1664 = vmatpush3.bf16.msra.mxu0 %v1661_v42 }
 0x1f8   :  { %1660 = vmatpush3.bf16.msra.mxu1 %v1859_v9  ;;  %1585 = vmatprep.mubr.msk.f32.mxu0 %vm63_vm0, %v1855_v2 }
 0x1f9   :  { %1576 = vmatprep.subr.mxu1 %v1873_v11  ;;  %1666 = vmatprep.subr.bf16.mxu0 %v1859_v9 }
 0x1fa   :  { %1586 = vmatmul.mubr.msk.f32.vlgmr.msra.gmra.mrb[12].mxu0 %vm63_vm0, %v1861_v10 }
 0x1fb   :  { %1668 = vmatpush3.bf16.msra.mxu0 %v1859_v9 }
 0x1fc   :  { %1577 = vmatpush3.msra.mxu1 %v1873_v11  ;;  %1592 = vmatprep.subr.mxu0 %v1873_v11 }
 0x1fd   :  { %1670 = vmatprep.subr.bf16.mxu1 %v1669_v45 }
 0x1ff   :  { %1593 = vmatpush3.msra.mxu0 %v1873_v11 }
 0x2c6   :  { %v1548_v46 = vpop.f32.mrb[6].mxu1 }
 0x2c7   :  { %714 = vst [vmem:[#allocation8 + $0x38] sm:$0xf] %v1548_v46  ;;  %v703_v47 = vpop.f32.mrb[7].mxu1 }
 0x2c8   :  { %713 = vst [vmem:[#allocation8 + $0x30] sm:$0xff] %v703_v47 }
 0x2c9   :  { %v1564_v50 = vpop.f32.mrb[10].mxu0 }
 0x2ca   :  { %v1571_v48 = vpop.f32.mrb[8].mxu1  ;;  %876 = vst [vmem:[#allocation8 + $0x48] sm:$0xf] %v1564_v50  ;;  %v865_v51 = vpop.f32.mrb[11].mxu0 }
 0x2cb   :  { %v946_v49 = vpop.f32.mrb[9].mxu1  ;;  %875 = vst [vmem:[#allocation8 + $0x40] sm:$0xff] %v865_v51 }
 0x2cc   :  { %1578 = vmatprep.mubr.msk.f32.mxu1 %vm145_vm1, %v946_v49 }
 0x2cd   :  { %1579 = vmatmul.mubr.msk.f32.vlgmr.msra.gmra.mrb[10].mxu1 %vm145_vm1, %v1571_v48  ;;  %v1587_v52 = vpop.f32.mrb[12].mxu0 }
 0x2ce   :  { %1672 = vmatpush3.bf16.msra.mxu1 %v1669_v45  ;;  %1601 = vmatprep.mubr.msk.f32.mxu1 %vm63_vm0, %v1855_v2  ;;  %v1108_v53 = vpop.f32.mrb[13].mxu0 }
 0x2cf   :  { %1674 = vmatprep.subr.bf16.mxu1 %v1859_v9  ;;  %1594 = vmatprep.mubr.msk.f32.mxu0 %vm145_vm1, %v1108_v53 }
 0x2d0   :  { %1595 = vmatmul.mubr.msk.f32.vlgmr.msra.gmra.mrb[14].mxu0 %vm145_vm1, %v1587_v52 }
 0x2d1   :  { %1602 = vmatmul.mubr.msk.f32.vlgmr.msra.gmra.mrb[12].mxu1 %vm63_vm0, %v1861_v10 }
 0x2d2   :  { %1676 = vmatpush3.bf16.msra.mxu1 %v1859_v9 }
 0x2d3   :  { %1608 = vmatprep.subr.mxu1 %v1873_v11 }
 0x2d6   :  { %1609 = vmatpush3.msra.mxu1 %v1873_v11 }
 0x3a0   :  { %v1580_v54 = vpop.f32.mrb[10].mxu1 }
 0x3a1   :  { %1038 = vst [vmem:[#allocation8 + $0x58] sm:$0xf] %v1580_v54  ;;  %v1027_v55 = vpop.f32.mrb[11].mxu1 }
 0x3a2   :  { %1037 = vst [vmem:[#allocation8 + $0x50] sm:$0xff] %v1027_v55 }
 0x3a3   :  { %v1596_v58 = vpop.f32.mrb[14].mxu0 }
 0x3a4   :  { %v1603_v56 = vpop.f32.mrb[12].mxu1  ;;  %1200 = vst [vmem:[#allocation8 + $0x68] sm:$0xf] %v1596_v58  ;;  %v1189_v59 = vpop.f32.mrb[15].mxu0 }
 0x3a5   :  { %v1270_v57 = vpop.f32.mrb[13].mxu1  ;;  %1199 = vst [vmem:[#allocation8 + $0x60] sm:$0xff] %v1189_v59 }
 0x3a6   :  { %1610 = vmatprep.mubr.msk.f32.mxu1 %vm145_vm1, %v1270_v57 }
 0x3a7   :  { %1611 = vmatmul.mubr.msk.f32.vlgmr.msra.gmra.mrb[14].mxu1 %vm145_vm1, %v1603_v56 }
 0x47a   :  { %v1612_v60 = vpop.f32.mrb[14].mxu1 }
 0x47b   :  { %1362 = vst [vmem:[#allocation8 + $0x78] sm:$0xf] %v1612_v60  ;;  %v1351_v61 = vpop.f32.mrb[15].mxu1 }
 0x47c   :  { %1361 = vst [vmem:[#allocation8 + $0x70] sm:$0xff] %v1351_v61 }
 0x47d   :  { %1760 = shalt.err (!%p1757_p0)
}
 0x47e   :  { %s1761_s27 = scalar_lea.hbm %s1961_s3, 2048 }
 0x47f   :  { %p1762_p1 = scmp.ne.s32.totalorder %s1961_s3, %s1761_s27  ;;  %p1765_p2 = scmp.lt.u32.totalorder %s1761_s27, %s1961_s3 }
 0x481   :  { %p1767_p3 = pnand %p1765_p2, %p1762_p1 }
 0x483   :  { %1770 = shalt.err (!%p1767_p3)
}
 0x484   :  { %1374 = dma.vmem_to_hbm [thread:$0]  %s1369_s21, 2048, %s1961_s3, [#allocation4], %s1779_s24, %s1779_s24, %s1780_s25  }
 0x485   :  { %1775 = dma.done.wait [#allocation4], 2048  }
 0x486   :  { %1776 = vsyncadd [#allocation4], 4294965248 }
 0x487   :  { %1378 = vsyncpa [#allocation3], 1 }
 0x488   :  { %1379 = vsyncpa [#allocation6], 1 }
 0x489   :  { %1380 = vsyncpa [#allocation4], 1 }

</bundles_post_ra>
